<compile_context>
chip_gen: v6e
topology: v6e:2x2x1
jax: 0.10.0
libtpu: 0.0.40
codegen_flags: <defaults>
</compile_context>

<pallas_src>
import functools

import jax
import jax.numpy as jnp
from jax.experimental import pallas as pl
from jax.experimental.pallas import tpu as pltpu

EXP_GAMMA = 0.5
RAIN_WEIGHT = 1.0
CLEAN_ATTEN_WEIGHT = 0.1
GAMMA_S = 0.9

_LANES = 128
_MAX_BLOCK_ROWS = 2048  # 2048x128 f32 = 1 MiB/input; x3 inputs x2 buffers = 6 MiB VMEM


def _loss_kernel(rain_pred_ref, clean_att_ref, rain_tgt_ref,   # inputs (VMEM tiles)
                 out_ref,                                       # (3,) SMEM output
                 acc_ref,                                       # (2,8,128) VMEM scratch
                 *, inv_n, exp_gamma, rain_weight, clean_atten_weight, gamma_s,
                 block_rows, rows_total, needs_row_mask):
    i = pl.program_id(0)

    @pl.when(i == 0)
    def _init():
        acc_ref[...] = jnp.zeros_like(acc_ref)

    rt = rain_tgt_ref[...].astype(jnp.float32)
    rp = rain_pred_ref[...].astype(jnp.float32)
    ca = clean_att_ref[...].astype(jnp.float32)

    rain_mask = rt != 0.0
    diff = rt - rp
    delta = diff * diff
    weight = 1.0 - gamma_s * jnp.exp(-exp_gamma * rt)
    if rain_weight == 1.0:
        # Static specialization: where(rain, w*1.0, w) == w.
        sample_weights = weight
    else:
        sample_weights = weight * jnp.where(rain_mask, jnp.float32(rain_weight),
                                            jnp.float32(1.0))
    rain_elem = sample_weights * delta
    # dry_mask * clean_attenuation**2  ==  where(rain, 0, ca*ca)
    clean_elem = jnp.where(rain_mask, jnp.float32(0.0), ca * ca)

    if needs_row_mask:
        # Last grid block extends past the (rows_total, 128) array -> those
        # VMEM rows are garbage; zero their contributions (select avoids any
        # inf/nan propagation from garbage rt/rp/ca).
        row_ids = (jax.lax.broadcasted_iota(jnp.int32, rain_elem.shape, 0)
                   + i * block_rows)
        valid = row_ids < rows_total
        rain_elem = jnp.where(valid, rain_elem, 0.0)
        clean_elem = jnp.where(valid, clean_elem, 0.0)

    # Vector accumulate: (block_rows,128) -> (8,128) via across-vreg VALU adds;
    # keeps the cross-lane reduce and SMEM writes out of the hot loop.
    acc_ref[0] += rain_elem.reshape(block_rows // 8, 8, _LANES).sum(axis=0)
    acc_ref[1] += clean_elem.reshape(block_rows // 8, 8, _LANES).sum(axis=0)

    @pl.when(i == pl.num_programs(0) - 1)
    def _finalize():
        rain_loss = jnp.sum(acc_ref[0]) * inv_n
        clean_loss = jnp.sum(acc_ref[1]) * inv_n
        # Matches the reference exactly (rain_loss intentionally counted twice,
        # as in the original PyTorch module: rain_loss + rain_weight*rain_loss).
        out_ref[0] = rain_loss + clean_atten_weight * clean_loss + rain_weight * rain_loss
        out_ref[1] = rain_loss
        out_ref[2] = clean_loss


def enhanced_rain_estimation_loss(model_output, rain_target,
                                  exp_gamma=EXP_GAMMA,
                                  rain_weight=RAIN_WEIGHT,
                                  clean_atten_weight=CLEAN_ATTEN_WEIGHT,
                                  gamma_s=GAMMA_S,
                                  block_rows=None):
    rain_pred = model_output["rain_rate_avg"]
    clean_attenuation = model_output["clean_attenuation"]

    n = int(rain_target.size)
    assert n > 0

    # Native sublane packing: 8 rows for 4-byte, 16 for 2-byte, 32 for 1-byte.
    itemsizes = [jnp.dtype(a.dtype).itemsize
                 for a in (rain_pred, clean_attenuation, rain_target)]
    sub_mult = max(8 * (4 // it) for it in itemsizes)

    rows = max(1, -(-n // _LANES))
    rows_alloc = max(rows, sub_mult)
    needs_pad = (rows_alloc * _LANES) != n   # ragged last row or too few rows

    if block_rows is None:
        block_rows = _MAX_BLOCK_ROWS
    block_rows = min(block_rows, rows_alloc)
    block_rows = max(sub_mult, (block_rows // sub_mult) * sub_mult)

    num_blocks = -(-rows_alloc // block_rows)
    needs_row_mask = (rows_alloc % block_rows) != 0

    def _prep(x):
        # Contiguous flatten + reshape is a free bitcast in XLA (fast path).
        flat = x.reshape(-1)
        if needs_pad:
            # Only ragged / tiny inputs pay a copy.  Zero padding is neutral:
            # rt=0 -> dry, delta contribution masked by weight*0; ca=0 -> no
            # clean-attenuation contribution.  The mean divisor stays n.
            flat = jnp.pad(flat, (0, rows_alloc * _LANES - n))
        return flat.reshape(rows_alloc, _LANES)

    rp2 = _prep(rain_pred)          # keep native dtype (bf16 ok); cast in kernel
    ca2 = _prep(clean_attenuation)
    rt2 = _prep(rain_target)

    kernel = functools.partial(
        _loss_kernel,
        inv_n=float(1.0 / n),
        exp_gamma=float(exp_gamma),
        rain_weight=float(rain_weight),
        clean_atten_weight=float(clean_atten_weight),
        gamma_s=float(gamma_s),
        block_rows=int(block_rows),
        rows_total=int(rows_alloc),
        needs_row_mask=bool(needs_row_mask),
    )

    in_spec = pl.BlockSpec((block_rows, _LANES), lambda i: (i, 0))
    n_elems = rows_alloc * _LANES
    bytes_in = sum(itemsizes) * n_elems

    out = pl.pallas_call(
        kernel,
        out_shape=jax.ShapeDtypeStruct((3,), jnp.float32),
        grid=(num_blocks,),
        in_specs=[in_spec, in_spec, in_spec],
        out_specs=pl.BlockSpec(memory_space=pltpu.MemorySpace.SMEM),
        scratch_shapes=[pltpu.VMEM((2, 8, _LANES), jnp.float32)],
        compiler_params=pltpu.CompilerParams(
            dimension_semantics=("arbitrary",)),
        cost_estimate=pl.CostEstimate(
            flops=12 * n_elems,
            transcendentals=n_elems,
            bytes_accessed=bytes_in + 12),
    )(rp2, ca2, rt2)

    return {
        "total_loss": out[0],
        "rain_loss": out[1],
        "clean_atten_loss": out[2],
    }


def _reference(model_output, rain_target,
               exp_gamma=EXP_GAMMA, rain_weight=RAIN_WEIGHT,
               clean_atten_weight=CLEAN_ATTEN_WEIGHT, gamma_s=GAMMA_S):
    rain_pred = model_output["rain_rate_avg"]
    clean_attenuation = model_output["clean_attenuation"]
    rain_mask = rain_target != 0
    dry_mask = ~rain_mask
    delta = (rain_target - rain_pred) ** 2
    weight = 1 - gamma_s * jnp.exp(-exp_gamma * rain_target)
    sample_weights = jnp.where(rain_mask, weight * rain_weight, weight)
    rain_loss = jnp.mean(sample_weights * delta)
    clean_atten_loss = jnp.mean(dry_mask.astype(jnp.float32) * clean_attenuation ** 2)
    total_loss = rain_loss + clean_atten_weight * clean_atten_loss + rain_weight * rain_loss
    return {"total_loss": total_loss, "rain_loss": rain_loss,
            "clean_atten_loss": clean_atten_loss}


if __name__ == "__main__":
    key = jax.random.PRNGKey(0)

    def make_inputs(k, batch, window, dtype=jnp.float32):
        k1, k2, k3 = jax.random.split(k, 3)
        raw = jax.random.uniform(k1, (batch, window), jnp.float32, 0.0, 5.0)
        rain_target = jnp.where(raw > 2.5, raw, 0.0)   # exact zeros -> dry periods
        rain_pred = jnp.abs(jax.random.normal(k2, (batch, window), jnp.float32)) * 2.0
        clean_att = jax.random.normal(k3, (batch, window), jnp.float32) * 0.1
        mo = {"rain_rate_avg": rain_pred.astype(dtype),
              "clean_attenuation": clean_att.astype(dtype)}
        return mo, rain_target.astype(dtype)

    def check(out, ref, tag):
        for k in out:
            assert jnp.allclose(out[k], ref[k], rtol=1e-5, atol=1e-6), \
                (tag, k, out[k], ref[k])

    ks = jax.random.split(key, 4)

    # Test 1: canonical [batch_size, window_size] shape (tiny -> pad-to-8-rows path).
    mo1, rt1 = make_inputs(ks[0], 2, 128)
    out1 = {k: jax.block_until_ready(v)
            for k, v in enhanced_rain_estimation_loss(mo1, rt1).items()}
    check(out1, _reference(mo1, rt1), "t1")

    # Test 2: ragged window (n % 128 != 0) + forced small block -> multi-step grid,
    # pad path + in-kernel tail-row masking + multi-step VMEM accumulator.
    mo2, rt2 = make_inputs(ks[1], 6, 200)
    out2 = {k: jax.block_until_ready(v)
            for k, v in enhanced_rain_estimation_loss(mo2, rt2, block_rows=8).items()}
    check(out2, _reference(mo2, rt2), "t2")

    # Test 3: n % 128 == 0 fast path (no pad copy) with a partial last grid block
    # (15 rows, block_rows=8) -> exercises the row mask on the no-pad path.
    mo3, rt3 = make_inputs(ks[2], 5, 384)
    out3 = {k: jax.block_until_ready(v)
            for k, v in enhanced_rain_estimation_loss(mo3, rt3, block_rows=8).items()}
    check(out3, _reference(mo3, rt3), "t3")

    # Test 4: bf16 inputs kept in bf16 (halved HBM traffic), 16-row sublane packing;
    # reference computed on the f32-cast of the same bf16 values (kernel math is f32).
    mo4_bf16, rt4_bf16 = make_inputs(ks[3], 2, 1024, dtype=jnp.bfloat16)
    out4 = {k: jax.block_until_ready(v)
            for k, v in enhanced_rain_estimation_loss(mo4_bf16, rt4_bf16).items()}
    mo4_f32 = {k: v.astype(jnp.float32) for k, v in mo4_bf16.items()}
    check(out4, _reference(mo4_f32, rt4_bf16.astype(jnp.float32)), "t4")

    print("KERNEL_OK")
</pallas_src>

<mosaic_0001>
module attributes {stable_mosaic.version = 11 : i64} {
  func.func @_loss_kernel(%arg0: i32, %arg1: memref<8x128xf32, #tpu.memory_space<vmem>>, %arg2: memref<8x128xf32, #tpu.memory_space<vmem>>, %arg3: memref<8x128xf32, #tpu.memory_space<vmem>>, %arg4: memref<3xf32, #tpu.memory_space<smem>>, %arg5: memref<2x8x128xf32, #tpu.memory_space<vmem>>) attributes {dimension_semantics = [#tpu.dimension_semantics<arbitrary>], iteration_bounds = array<i64: 1>, scalar_prefetch = 0 : i64, scratch_operands = 1 : i64, tpu.core_type = #tpu.core_type<tc>, window_params = [{transform_indices = @transform_0, window_bounds = array<i64: 8, 128>}, {transform_indices = @transform_1, window_bounds = array<i64: 8, 128>}, {transform_indices = @transform_2, window_bounds = array<i64: 8, 128>}, {transform_indices = @transform_3, window_bounds = array<i64: 3>}]} {
    %c0_i32 = arith.constant 0 : i32
    %0 = arith.cmpi eq, %arg0, %c0_i32 : i32
    %1 = arith.extui %0 : i1 to i32
    %c0_i32_0 = arith.constant 0 : i32
    %2 = arith.cmpi ne, %1, %c0_i32_0 : i32
    scf.if %2 {
      %cst_25 = arith.constant 0.000000e+00 : f32
      %40 = vector.broadcast %cst_25 : f32 to vector<2x8x128xf32>
      %c0_26 = arith.constant 0 : index
      %c0_27 = arith.constant 0 : index
      %c0_28 = arith.constant 0 : index
      %41 = vector.load %arg5[%c0_26, %c0_27, %c0_28] : memref<2x8x128xf32, #tpu.memory_space<vmem>>, vector<2x8x128xf32>
      tpu.vector_store %arg5[%c0_26, %c0_27, %c0_28], %40 {strides = array<i32>} : memref<2x8x128xf32, #tpu.memory_space<vmem>>, vector<2x8x128xf32>,
    } else {
    }
    %c0 = arith.constant 0 : index
    %c0_1 = arith.constant 0 : index
    %3 = vector.load %arg3[%c0, %c0_1] : memref<8x128xf32, #tpu.memory_space<vmem>>, vector<8x128xf32>
    %c0_2 = arith.constant 0 : index
    %c0_3 = arith.constant 0 : index
    %4 = vector.load %arg1[%c0_2, %c0_3] : memref<8x128xf32, #tpu.memory_space<vmem>>, vector<8x128xf32>
    %c0_4 = arith.constant 0 : index
    %c0_5 = arith.constant 0 : index
    %5 = vector.load %arg2[%c0_4, %c0_5] : memref<8x128xf32, #tpu.memory_space<vmem>>, vector<8x128xf32>
    %cst = arith.constant 0.000000e+00 : f32
    %6 = vector.broadcast %cst : f32 to vector<8x128xf32>
    %7 = arith.cmpf one, %3, %6 : vector<8x128xf32>
    %8 = arith.subf %3, %4 : vector<8x128xf32>
    %9 = arith.mulf %8, %8 : vector<8x128xf32>
    %cst_6 = arith.constant -5.000000e-01 : f32
    %10 = vector.broadcast %cst_6 : f32 to vector<8x128xf32>
    %11 = arith.mulf %10, %3 : vector<8x128xf32>
    %12 = math.exp %11 : vector<8x128xf32>
    %cst_7 = arith.constant 0.899999976 : f32
    %13 = vector.broadcast %cst_7 : f32 to vector<8x128xf32>
    %14 = arith.mulf %13, %12 : vector<8x128xf32>
    %cst_8 = arith.constant 1.000000e+00 : f32
    %15 = vector.broadcast %cst_8 : f32 to vector<8x128xf32>
    %16 = arith.subf %15, %14 : vector<8x128xf32>
    %17 = arith.mulf %16, %9 : vector<8x128xf32>
    %18 = arith.mulf %5, %5 : vector<8x128xf32>
    %cst_9 = arith.constant 0.000000e+00 : f32
    %19 = vector.broadcast %cst_9 : f32 to vector<8x128xf32>
    %20 = arith.select %7, %19, %18 : vector<8x128xi1>, vector<8x128xf32>
    %c0_10 = arith.constant 0 : index
    %c0_11 = arith.constant 0 : index
    %c0_12 = arith.constant 0 : index
    %21 = vector.load %arg5[%c0_10, %c0_11, %c0_12] : memref<2x8x128xf32, #tpu.memory_space<vmem>>, vector<1x8x128xf32>
    %22 = vector.shape_cast %21 : vector<1x8x128xf32> to vector<8x128xf32>
    %23 = vector.shape_cast %17 : vector<8x128xf32> to vector<1x8x128xf32>
    %cst_13 = arith.constant dense<0.000000e+00> : vector<8x128xf32>
    %24 = vector.multi_reduction <add>, %23, %cst_13 [0] : vector<1x8x128xf32> to vector<8x128xf32>
    %25 = arith.addf %22, %24 : vector<8x128xf32>
    %c0_14 = arith.constant 0 : index
    %c0_15 = arith.constant 0 : index
    %c0_16 = arith.constant 0 : index
    %26 = vector.load %arg5[%c0_14, %c0_15, %c0_16] : memref<2x8x128xf32, #tpu.memory_space<vmem>>, vector<1x8x128xf32>
    %27 = vector.shape_cast %26 : vector<1x8x128xf32> to vector<8x128xf32>
    %28 = vector.shape_cast %25 : vector<8x128xf32> to vector<1x8x128xf32>
    tpu.vector_store %arg5[%c0_14, %c0_15, %c0_16], %28 {strides = array<i32>} : memref<2x8x128xf32, #tpu.memory_space<vmem>>, vector<1x8x128xf32>,
    %c1 = arith.constant 1 : index
    %c0_17 = arith.constant 0 : index
    %c0_18 = arith.constant 0 : index
    %29 = vector.load %arg5[%c1, %c0_17, %c0_18] : memref<2x8x128xf32, #tpu.memory_space<vmem>>, vector<1x8x128xf32>
    %30 = vector.shape_cast %29 : vector<1x8x128xf32> to vector<8x128xf32>
    %31 = vector.shape_cast %20 : vector<8x128xf32> to vector<1x8x128xf32>
    %cst_19 = arith.constant dense<0.000000e+00> : vector<8x128xf32>
    %32 = vector.multi_reduction <add>, %31, %cst_19 [0] : vector<1x8x128xf32> to vector<8x128xf32>
    %33 = arith.addf %30, %32 : vector<8x128xf32>
    %c1_20 = arith.constant 1 : index
    %c0_21 = arith.constant 0 : index
    %c0_22 = arith.constant 0 : index
    %34 = vector.load %arg5[%c1_20, %c0_21, %c0_22] : memref<2x8x128xf32, #tpu.memory_space<vmem>>, vector<1x8x128xf32>
    %35 = vector.shape_cast %34 : vector<1x8x128xf32> to vector<8x128xf32>
    %36 = vector.shape_cast %33 : vector<8x128xf32> to vector<1x8x128xf32>
    tpu.vector_store %arg5[%c1_20, %c0_21, %c0_22], %36 {strides = array<i32>} : memref<2x8x128xf32, #tpu.memory_space<vmem>>, vector<1x8x128xf32>,
    %c0_i32_23 = arith.constant 0 : i32
    %37 = arith.cmpi eq, %arg0, %c0_i32_23 : i32
    %38 = arith.extui %37 : i1 to i32
    %c0_i32_24 = arith.constant 0 : i32
    %39 = arith.cmpi ne, %38, %c0_i32_24 : i32
    scf.if %39 {
      %c0_25 = arith.constant 0 : index
      %c0_26 = arith.constant 0 : index
      %c0_27 = arith.constant 0 : index
      %40 = vector.load %arg5[%c0_25, %c0_26, %c0_27] : memref<2x8x128xf32, #tpu.memory_space<vmem>>, vector<1x8x128xf32>
      %41 = vector.shape_cast %40 : vector<1x8x128xf32> to vector<8x128xf32>
      %42 = vector.shape_cast %41 : vector<8x128xf32> to vector<1x8x128xf32>
      %cst_28 = arith.constant dense<0.000000e+00> : vector<1xf32>
      %43 = vector.multi_reduction <add>, %42, %cst_28 [1, 2] : vector<1x8x128xf32> to vector<1xf32>
      %44 = vector.shape_cast %43 : vector<1xf32> to vector<1x1x1xf32>
      %45 = vector.extract %44[0, 0, 0] : f32 from vector<1x1x1xf32>
      %cst_29 = arith.constant 3.906250e-03 : f32
      %46 = arith.mulf %45, %cst_29 : f32
      %c1_30 = arith.constant 1 : index
      %c0_31 = arith.constant 0 : index
      %c0_32 = arith.constant 0 : index
      %47 = vector.load %arg5[%c1_30, %c0_31, %c0_32] : memref<2x8x128xf32, #tpu.memory_space<vmem>>, vector<1x8x128xf32>
      %48 = vector.shape_cast %47 : vector<1x8x128xf32> to vector<8x128xf32>
      %49 = vector.shape_cast %48 : vector<8x128xf32> to vector<1x8x128xf32>
      %cst_33 = arith.constant dense<0.000000e+00> : vector<1xf32>
      %50 = vector.multi_reduction <add>, %49, %cst_33 [1, 2] : vector<1x8x128xf32> to vector<1xf32>
      %51 = vector.shape_cast %50 : vector<1xf32> to vector<1x1x1xf32>
      %52 = vector.extract %51[0, 0, 0] : f32 from vector<1x1x1xf32>
      %cst_34 = arith.constant 3.906250e-03 : f32
      %53 = arith.mulf %52, %cst_34 : f32
      %cst_35 = arith.constant 1.000000e-01 : f32
      %54 = arith.mulf %cst_35, %53 : f32
      %55 = arith.addf %46, %54 : f32
      %cst_36 = arith.constant 1.000000e+00 : f32
      %56 = arith.mulf %cst_36, %46 : f32
      %57 = arith.addf %55, %56 : f32
      %c0_37 = arith.constant 0 : index
      %58 = memref.load %arg4[%c0_37] : memref<3xf32, #tpu.memory_space<smem>>
      memref.store %57, %arg4[%c0_37] : memref<3xf32, #tpu.memory_space<smem>>
      %c1_38 = arith.constant 1 : index
      %59 = memref.load %arg4[%c1_38] : memref<3xf32, #tpu.memory_space<smem>>
      memref.store %46, %arg4[%c1_38] : memref<3xf32, #tpu.memory_space<smem>>
      %c2 = arith.constant 2 : index
      %60 = memref.load %arg4[%c2] : memref<3xf32, #tpu.memory_space<smem>>
      memref.store %53, %arg4[%c2] : memref<3xf32, #tpu.memory_space<smem>>
    } else {
    }
    return
  }
  func.func @transform_0(%arg0: i32) -> (i32, i32) {
    %c0_i32 = arith.constant 0 : i32
    %c0_i32_0 = arith.constant 0 : i32
    return %arg0, %c0_i32 : i32, i32
  }
  func.func @transform_1(%arg0: i32) -> (i32, i32) {
    %c0_i32 = arith.constant 0 : i32
    %c0_i32_0 = arith.constant 0 : i32
    return %arg0, %c0_i32 : i32, i32
  }
  func.func @transform_2(%arg0: i32) -> (i32, i32) {
    %c0_i32 = arith.constant 0 : i32
    %c0_i32_0 = arith.constant 0 : i32
    return %arg0, %c0_i32 : i32, i32
  }
  func.func @transform_3(%arg0: i32) -> i32 {
    %c0_i32 = arith.constant 0 : i32
    %c0_i32_0 = arith.constant 0 : i32
    return %c0_i32 : i32
  }
}

</mosaic_0001>

<bundles_post_ra>
// kernel: tpu_custom_call.1
= control target key start
LH: loop header
LB: loop body
LE: loop exit
PB: predicated region body
PF: predicated region fallthrough
CT: control target
= control target key end

     0   :  { %8 = vsyncpa [#allocation4], 0  ;;  %s248_s0 = inlined_call_operand.hbm [shape: f32[8,128], index: 0, kind: input, shape index: {}]   ;;  %s249_s1 = inlined_call_operand.hbm [shape: f32[8,128], index: 1, kind: input, shape index: {}]   ;;  %s250_s2 = inlined_call_operand.hbm [shape: f32[8,128], index: 2, kind: input, shape index: {}]   ;;  %s251_s3 = inlined_call_operand.hbm [shape: f32[3], index: 3, kind: output, shape index: {}]  }
   0x1   :  { %9 = vsyncpa [#allocation7], 0 }
   0x2   :  { %10 = vsyncpa [#allocation5], 0  ;;  %s212_s12 = smov [#allocation6]   ;;  %s213_s14 = smov [#allocation3]  }
   0x3   :  { %s27_s13 = sshll.u32 %s212_s12, 4  ;;  %s17_s15 = sshll.u32 %s213_s14, 4  ;;  %s28_s13 = int_to_ptr.vmem [resolvable:$true] %s27_s13  ;;  %s18_s15 = int_to_ptr.vmem [resolvable:$true] %s17_s15 }
   0x4   :  { %s146_s16 = scalar_lea.vmem %s28_s13, 128  ;;  %p151_p1 = scmp.lt.s32.totalorder %s28_s13, %s28_s13 }
   0x5   :  { %p147_p0 = scmp.ne.s32.totalorder %s28_s13, %s146_s16  ;;  %p152_p2 = scmp.lt.s32.totalorder %s146_s16, %s146_s16 }
   0x7   :  { %p153_p3 = por %p152_p2, %p151_p1 }
   0x9   :  { %p154_p4 = pnand %p153_p3, %p147_p0 }
   0xb   :  { %157 = shalt.err (!%p154_p4)
}
   0xc   :  { %30 = dma.hbm_to_vmem [thread:$0]  %s249_s1, 128, %s28_s13, [#allocation7]  }
   0xd   :  { %s166_s19 = scalar_lea.vmem %s18_s15, 128  ;;  %p171_p6 = scmp.lt.s32.totalorder %s18_s15, %s18_s15 }
   0xe   :  { %p167_p5 = scmp.ne.s32.totalorder %s18_s15, %s166_s19  ;;  %p172_p7 = scmp.lt.s32.totalorder %s166_s19, %s166_s19 }
  0x10   :  { %p173_p8 = por %p172_p7, %p171_p6 }
  0x12   :  { %p174_p9 = pnand %p173_p8, %p167_p5 }
  0x14   :  { %177 = shalt.err (!%p174_p9)
}
  0x15   :  { %20 = dma.hbm_to_vmem [thread:$0]  %s248_s0, 128, %s18_s15, [#allocation4]  }
  0x16   :  { %s214_s22 = smov [#allocation8]  }
  0x17   :  { %s37_s23 = sshll.u32 %s214_s22, 4  ;;  %s38_s23 = int_to_ptr.vmem [resolvable:$true] %s37_s23 }
  0x18   :  { %s186_s24 = scalar_lea.vmem %s38_s23, 128  ;;  %p191_p11 = scmp.lt.s32.totalorder %s38_s23, %s38_s23 }
  0x19   :  { %p187_p10 = scmp.ne.s32.totalorder %s38_s23, %s186_s24  ;;  %p192_p12 = scmp.lt.s32.totalorder %s186_s24, %s186_s24 }
  0x1b   :  { %p193_p13 = por %p192_p12, %p191_p11 }
  0x1d   :  { %p194_p0 = pnand %p193_p13, %p187_p10 }
  0x1f   :  { %197 = shalt.err (!%p194_p0)
}
  0x20   :  { %40 = dma.hbm_to_vmem [thread:$0]  %s250_s2, 128, %s38_s23, [#allocation7]  }
  0x21   :  { %206 = dma.done.wait [#allocation4], 128  }
  0x22   :  { %207 = vsyncadd [#allocation4], 4294967168 }
  0x23   :  { %208 = dma.done.wait [#allocation7], 256  }
  0x24   :  { %209 = vsyncadd [#allocation7], 4294967040  ;;  %v56_v0 = vld [vmem:[#allocation8] sm:$0xff]  ;;  %v57_v3 = vld [vmem:[#allocation3] sm:$0xff]  ;;  %s215_s4 = smov [#allocation9]  }
  0x25   :  { %v62_v1 = vmul.f32 -0.5, %v56_v0  ;;  %v60_v4 = vsub.f32 %v56_v0, %v57_v3  ;;  %v58_v8 = vld [vmem:[#allocation6] sm:$0xff]  ;;  %vm59_vm0 = vcmp.ne.f32.partialorder %v56_v0, 0.0 }
  0x26   :  { %v68_v10 = vmul.f32 %v58_v8, %v58_v8 }
  0x27   :  { %v63_v2 = vmul.f32 1.442695, %v62_v1  ;;  %v61_v6 = vmul.f32 %v60_v4, %v60_v4 }
  0x28   :  { %v69_v12 = vsel %vm59_vm0, 0.0, %v68_v10 }
  0x29   :  { %136 = vpow2.f32 %v63_v2 }
  0x36   :  { %v137_v5 = vpop.eup %136 }
  0x37   :  { %v65_v7 = vmul.f32 0.9, %v137_v5 }
  0x39   :  { %v66_v9 = vsub.f32 1.0, %v65_v7 }
  0x3b   :  { %v67_v11 = vmul.f32 %v66_v9, %v61_v6 }
  0x3d   :  { %83 = vadd.xlane.f32.xlu0 %v67_v11 }
  0x41   :  { %94 = vadd.xlane.f32.xlu0 %v69_v12 }
  0xc6   :  { %v84_v13 = vpop.xlane.xlu0 %83 }
  0xc7   :  { %v85_v14 = vrot.slane %v84_v13, 4 }
  0xc9   :  { %v86_v15 = vadd.f32 %v85_v14, %v84_v13 }
  0xca   :  { %v95_v16 = vpop.xlane.xlu0 %94 }
  0xcb   :  { %v87_v17 = vrot.slane %v86_v15, 2  ;;  %v96_v18 = vrot.slane %v95_v16, 4 }
  0xcd   :  { %v97_v19 = vadd.f32 %v96_v18, %v95_v16  ;;  %v88_v20 = vadd.f32 %v87_v17, %v86_v15 }
  0xcf   :  { %v98_v21 = vrot.slane %v97_v19, 2  ;;  %v89_v22 = vrot.slane %v88_v20, 1 }
  0xd1   :  { %v99_v23 = vadd.f32 %v98_v21, %v97_v19  ;;  %v90_v24 = vadd.f32 %v89_v22, %v88_v20 }
  0xd3   :  { %128 = vpush %v90_v24  ;;  %v100_v25 = vrot.slane %v99_v23, 1 }
  0xd5   :  { %v101_v26 = vadd.f32 %v100_v25, %v99_v23 }
  0xd7   :  { %130 = vpush %v101_v26 }
 0x104   :  { %s129_s0 = spop %128 }
 0x105   :  { %s92_s2 = smul.f32 0.00390625, %s129_s0 }
 0x107   :  { %110 = sst [smem:[#allocation9 + $0x1]] %s92_s2 }
 0x108   :  { %s131_s26 = spop %130 }
 0x109   :  { %s103_s27 = smul.f32 0.00390625, %s131_s26 }
 0x10b   :  { %s104_s28 = smul.f32 0.1, %s103_s27  ;;  %112 = sst [smem:[#allocation9 + $0x2]] %s103_s27 }
 0x10d   :  { %s105_s29 = sadd.f32 %s104_s28, %s92_s2 }
 0x10f   :  { %s106_s30 = sadd.f32 %s105_s29, %s92_s2 }
 0x111   :  { %108 = sst [smem:[#allocation9]] %s106_s30 }
 0x112   :  { %120 = dma.smem_to_hbm %s215_s4, 16, %s251_s3, [#allocation5]  }
 0x113   :  { %210 = dma.done.wait [#allocation5], 16  }
 0x114   :  { %211 = vsyncadd [#allocation5], 4294967280 }
 0x115   :  { %124 = sfence }
 0x116   :  { %125 = vsyncpa [#allocation4], 1 }
 0x117   :  { %126 = vsyncpa [#allocation7], 1 }
 0x118   :  { %127 = vsyncpa [#allocation5], 1 }

</bundles_post_ra>
